<compile_context>
chip_gen: v7x
topology: tpu7x:2x2x1
jax: 0.10.0
libtpu: 0.0.40
codegen_flags: <defaults>
</compile_context>

<pallas_src>
import functools

import jax
import jax.numpy as jnp
from jax.experimental import pallas as pl
from jax.experimental.pallas import tpu as pltpu


def dblock_kernel(x_ref, w12_ref, b12_ref, wh_ref, bh_ref, out_ref, *, hidden_size):
    x = x_ref[...]                                                    # [TB, In]

    # Fused fc1|fc2 -> [TB, 2H], accumulate in f32 on the MXU.
    h = jnp.dot(x, w12_ref[...], preferred_element_type=jnp.float32) + b12_ref[...]

    # Gate in f32 (v5e-safe; EUP handles tanh/sigmoid).
    t = jnp.tanh(h[:, :hidden_size]) * jax.nn.sigmoid(h[:, hidden_size:])  # [TB, H]

    # Fused fc_mu|fc_logsigma -> [TB, 2*out] lane-dense output slab.
    t = t.astype(wh_ref.dtype)
    out = jnp.dot(t, wh_ref[...], preferred_element_type=jnp.float32) + bh_ref[...]

    out_ref[...] = out.astype(out_ref.dtype)


def dblock_forward(x, params, *, block_batch=None, matmul_dtype=jnp.float32):
    """x: [B, input_size]. params: dict of per-layer weights/biases.

    Weights are fused host-side (w1|w2 -> [In, 2H], wmu|wls -> [H, 2*out]) and
    kept VMEM-resident across the batch grid; x and the fused output slab are
    pipelined per batch tile.
    """
    B, In = x.shape
    H = params["w1"].shape[1]
    out_size = params["wmu"].shape[1]

    # Fuse the paired linears (done once in the wrapper, outside the kernel).
    w12 = jnp.concatenate([params["w1"], params["w2"]], axis=1).astype(matmul_dtype)
    b12 = jnp.concatenate([params["b1"], params["b2"]], axis=1).astype(jnp.float32)
    wh = jnp.concatenate([params["wmu"], params["wls"]], axis=1).astype(matmul_dtype)
    bh = jnp.concatenate([params["bmu"], params["bls"]], axis=1).astype(jnp.float32)

    x_in = x.astype(matmul_dtype)

    # Batch tile: multiple of 8 (sublane), capped at 512 rows.  At these small
    # feature sizes the VMEM budget (2x double-buffered activations + resident
    # weights) is tiny, well under v7x's 64 MiB — no vmem_limit override needed.
    if block_batch is None:
        TB = min(512, max(8, ((B + 7) // 8) * 8))
    else:
        TB = block_batch
    Bp = pl.cdiv(B, TB) * TB
    if Bp != B:
        x_in = jnp.pad(x_in, ((0, Bp - B), (0, 0)))

    out = pl.pallas_call(
        functools.partial(dblock_kernel, hidden_size=H),
        out_shape=jax.ShapeDtypeStruct((Bp, 2 * out_size), jnp.float32),
        grid=(Bp // TB,),
        in_specs=[
            pl.BlockSpec((TB, In), lambda i: (i, 0)),          # x: pipelined
            pl.BlockSpec(w12.shape, lambda i: (0, 0)),         # weights: resident
            pl.BlockSpec(b12.shape, lambda i: (0, 0)),
            pl.BlockSpec(wh.shape, lambda i: (0, 0)),
            pl.BlockSpec(bh.shape, lambda i: (0, 0)),
        ],
        out_specs=pl.BlockSpec((TB, 2 * out_size), lambda i: (i, 0)),
        compiler_params=pltpu.CompilerParams(
            dimension_semantics=("parallel",),                 # megacore on v7x
        ),
    )(x_in, w12, b12, wh, bh)

    mu = out[:B, :out_size]
    logsigma = out[:B, out_size:]
    return mu, logsigma


def init_dblock_params(key, input_size, hidden_size, output_size):
    """Deterministic init mimicking torch.nn.Linear (uniform(-1/sqrt(fan_in)))."""
    def linear(k, fan_in, fan_out):
        kw, kb = jax.random.split(k)
        bound = 1.0 / jnp.sqrt(jnp.float32(fan_in))
        w = jax.random.uniform(kw, (fan_in, fan_out), jnp.float32, -bound, bound)
        b = jax.random.uniform(kb, (1, fan_out), jnp.float32, -bound, bound)
        return w, b

    k1, k2, k3, k4 = jax.random.split(key, 4)
    w1, b1 = linear(k1, input_size, hidden_size)
    w2, b2 = linear(k2, input_size, hidden_size)
    wmu, bmu = linear(k3, hidden_size, output_size)
    wls, bls = linear(k4, hidden_size, output_size)
    return dict(w1=w1, b1=b1, w2=w2, b2=b2,
                wmu=wmu, bmu=bmu, wls=wls, bls=bls)


def dblock_reference(x, p):
    t = jnp.tanh(x @ p["w1"] + p["b1"]) * jax.nn.sigmoid(x @ p["w2"] + p["b2"])
    return t @ p["wmu"] + p["bmu"], t @ p["wls"] + p["bls"]


if __name__ == "__main__":
    key = jax.random.PRNGKey(0)
    k_x, k_p = jax.random.split(key)

    batch, input_size, hidden_size, output_size = 8, 16, 32, 8
    x = jax.random.normal(k_x, (batch, input_size), jnp.float32)
    params = init_dblock_params(k_p, input_size, hidden_size, output_size)

    mu_ref, ls_ref = dblock_reference(x, params)

    # f32 path: tight check.
    mu, logsigma = dblock_forward(x, params, matmul_dtype=jnp.float32)
    jax.block_until_ready((mu, logsigma))
    assert mu.shape == (batch, output_size) and logsigma.shape == (batch, output_size)
    assert jnp.allclose(mu, mu_ref, atol=1e-5), "mu mismatch (f32)"
    assert jnp.allclose(logsigma, ls_ref, atol=1e-5), "logsigma mismatch (f32)"

    # bf16 matmul operands (f32 accumulation): loose check.
    mu_bf, ls_bf = dblock_forward(x, params, matmul_dtype=jnp.bfloat16)
    jax.block_until_ready((mu_bf, ls_bf))
    assert jnp.allclose(mu_bf, mu_ref, atol=5e-2), "mu mismatch (bf16)"
    assert jnp.allclose(ls_bf, ls_ref, atol=5e-2), "logsigma mismatch (bf16)"

    print("KERNEL_OK")
</pallas_src>

<mosaic_0001>
module attributes {stable_mosaic.version = 11 : i64} {
  func.func @dblock_kernel(%arg0: i32, %arg1: memref<8x16xf32, #tpu.memory_space<vmem>>, %arg2: memref<16x64xf32, #tpu.memory_space<vmem>>, %arg3: memref<1x64xf32, #tpu.memory_space<vmem>>, %arg4: memref<32x16xf32, #tpu.memory_space<vmem>>, %arg5: memref<1x16xf32, #tpu.memory_space<vmem>>, %arg6: memref<8x16xf32, #tpu.memory_space<vmem>>) attributes {dimension_semantics = [#tpu.dimension_semantics<parallel>], iteration_bounds = array<i64: 1>, scalar_prefetch = 0 : i64, scratch_operands = 0 : i64, tpu.core_type = #tpu.core_type<tc>, window_params = [{transform_indices = @transform_0, window_bounds = array<i64: 8, 16>}, {pipeline_mode = #tpu.pipeline_mode<synchronous>, transform_indices = @transform_1, window_bounds = array<i64: 16, 64>}, {pipeline_mode = #tpu.pipeline_mode<synchronous>, transform_indices = @transform_2, window_bounds = array<i64: 1, 64>}, {pipeline_mode = #tpu.pipeline_mode<synchronous>, transform_indices = @transform_3, window_bounds = array<i64: 32, 16>}, {pipeline_mode = #tpu.pipeline_mode<synchronous>, transform_indices = @transform_4, window_bounds = array<i64: 1, 16>}, {transform_indices = @transform_5, window_bounds = array<i64: 8, 16>}]} {
    %c0 = arith.constant 0 : index
    %c0_0 = arith.constant 0 : index
    %0 = vector.load %arg1[%c0, %c0_0] : memref<8x16xf32, #tpu.memory_space<vmem>>, vector<8x16xf32>
    %c0_1 = arith.constant 0 : index
    %c0_2 = arith.constant 0 : index
    %1 = vector.load %arg2[%c0_1, %c0_2] : memref<16x64xf32, #tpu.memory_space<vmem>>, vector<16x64xf32>
    %cst = arith.constant dense<0.000000e+00> : vector<8x64xf32>
    %2 = tpu.matmul %0, %1, %cst {dimension_numbers = #tpu.dot_dimension_numbers<[1], [0], [0], [1], [0, 0, 1, 1], [], []>} : vector<8x16xf32>, vector<16x64xf32>, vector<8x64xf32> -> vector<8x64xf32>
    %c0_3 = arith.constant 0 : index
    %c0_4 = arith.constant 0 : index
    %3 = vector.load %arg3[%c0_3, %c0_4] : memref<1x64xf32, #tpu.memory_space<vmem>>, vector<1x64xf32>
    %4 = vector.broadcast %3 : vector<1x64xf32> to vector<8x64xf32>
    %5 = arith.addf %2, %4 : vector<8x64xf32>
    %6 = vector.extract_strided_slice %5 {offsets = [0, 0], sizes = [8, 32], strides = [1, 1]} : vector<8x64xf32> to vector<8x32xf32>
    %7 = math.tanh %6 : vector<8x32xf32>
    %8 = vector.extract_strided_slice %5 {offsets = [0, 32], sizes = [8, 32], strides = [1, 1]} : vector<8x64xf32> to vector<8x32xf32>
    %9 = arith.negf %8 : vector<8x32xf32>
    %10 = math.exp %9 : vector<8x32xf32>
    %cst_5 = arith.constant 1.000000e+00 : f32
    %11 = vector.broadcast %cst_5 : f32 to vector<8x32xf32>
    %12 = arith.addf %11, %10 : vector<8x32xf32>
    %13 = arith.divf %11, %12 : vector<8x32xf32>
    %14 = arith.mulf %7, %13 : vector<8x32xf32>
    %c0_6 = arith.constant 0 : index
    %c0_7 = arith.constant 0 : index
    %15 = vector.load %arg4[%c0_6, %c0_7] : memref<32x16xf32, #tpu.memory_space<vmem>>, vector<32x16xf32>
    %cst_8 = arith.constant dense<0.000000e+00> : vector<8x16xf32>
    %16 = tpu.matmul %14, %15, %cst_8 {dimension_numbers = #tpu.dot_dimension_numbers<[1], [0], [0], [1], [0, 0, 1, 1], [], []>} : vector<8x32xf32>, vector<32x16xf32>, vector<8x16xf32> -> vector<8x16xf32>
    %c0_9 = arith.constant 0 : index
    %c0_10 = arith.constant 0 : index
    %17 = vector.load %arg5[%c0_9, %c0_10] : memref<1x16xf32, #tpu.memory_space<vmem>>, vector<1x16xf32>
    %18 = vector.broadcast %17 : vector<1x16xf32> to vector<8x16xf32>
    %19 = arith.addf %16, %18 : vector<8x16xf32>
    %c0_11 = arith.constant 0 : index
    %c0_12 = arith.constant 0 : index
    %20 = vector.load %arg6[%c0_11, %c0_12] : memref<8x16xf32, #tpu.memory_space<vmem>>, vector<8x16xf32>
    tpu.vector_store %arg6[%c0_11, %c0_12], %19 {strides = array<i32>} : memref<8x16xf32, #tpu.memory_space<vmem>>, vector<8x16xf32>,
    return
  }
  func.func @transform_0(%arg0: i32) -> (i32, i32) {
    %c0_i32 = arith.constant 0 : i32
    %c0_i32_0 = arith.constant 0 : i32
    return %arg0, %c0_i32 : i32, i32
  }
  func.func @transform_1(%arg0: i32) -> (i32, i32) {
    %c0_i32 = arith.constant 0 : i32
    %c0_i32_0 = arith.constant 0 : i32
    %c0_i32_1 = arith.constant 0 : i32
    return %c0_i32, %c0_i32_0 : i32, i32
  }
  func.func @transform_2(%arg0: i32) -> (i32, i32) {
    %c0_i32 = arith.constant 0 : i32
    %c0_i32_0 = arith.constant 0 : i32
    %c0_i32_1 = arith.constant 0 : i32
    return %c0_i32, %c0_i32_0 : i32, i32
  }
  func.func @transform_3(%arg0: i32) -> (i32, i32) {
    %c0_i32 = arith.constant 0 : i32
    %c0_i32_0 = arith.constant 0 : i32
    %c0_i32_1 = arith.constant 0 : i32
    return %c0_i32, %c0_i32_0 : i32, i32
  }
  func.func @transform_4(%arg0: i32) -> (i32, i32) {
    %c0_i32 = arith.constant 0 : i32
    %c0_i32_0 = arith.constant 0 : i32
    %c0_i32_1 = arith.constant 0 : i32
    return %c0_i32, %c0_i32_0 : i32, i32
  }
  func.func @transform_5(%arg0: i32) -> (i32, i32) {
    %c0_i32 = arith.constant 0 : i32
    %c0_i32_0 = arith.constant 0 : i32
    return %arg0, %c0_i32 : i32, i32
  }
}

</mosaic_0001>

<bundles_post_ra>
// kernel: tpu_custom_call.1
= control target key start
LH: loop header
LB: loop body
LE: loop exit
PB: predicated region body
PF: predicated region fallthrough
CT: control target
= control target key end

     0   :  { %v292_v2 = vmov 0.0|0.0   ;;  %vm293_vm0 = vmmov 0   ;;  %v294_v4 = vmov 0.0   ;;  %s368_s0 = inlined_call_operand.vmem [shape: f32[8,16], index: 0, kind: input, shape index: {}]   ;;  %s369_s1 = inlined_call_operand.vmem [shape: f32[16,64], index: 1, kind: input, shape index: {}]   ;;  %s370_s2 = inlined_call_operand.vmem [shape: f32[1,64], index: 2, kind: input, shape index: {}]   ;;  %s371_s3 = inlined_call_operand.vmem [shape: f32[32,16], index: 3, kind: input, shape index: {}]   ;;  %s372_s4 = inlined_call_operand.vmem [shape: f32[1,16], index: 4, kind: input, shape index: {}]   ;;  %s373_s5 = inlined_call_operand.hbm [shape: f32[8,16], index: 5, kind: output, shape index: {}]  }
   0x1   :  { %v22_v0 = vld [vmem:[%s369_s1] sm:$0xff]  ;;  %v23_v1 = vld [vmem:[%s369_s1 + $0x8] sm:$0xff]  ;;  %248 = vmatprep.subr.bf16.mxu0 %v292_v2  ;;  %234 = vmatprep.mubr.msk.f32.mxu0 %vm293_vm0, %v294_v4 }
   0x2   :  { %v249_v3 = vpack.c.bf16 %v23_v1, %v22_v0 }
   0x3   :  { %10 = vsyncpa [#allocation3], 0  ;;  %251 = vmatprep.subr.bf16.mxu1 %v292_v2  ;;  %245 = vmatprep.mubr.msk.f32.mxu1 %vm293_vm0, %v294_v4  ;;  %v21_v5 = vld [vmem:[%s368_s0] sm:$0xff]  ;;  %vm31_vm1 = vcmask 130048   ;;  %v118_v7 = vld [vmem:[%s371_s3 + $0x8] sm:$0xff]  ;;  %vm128_vm2 = vcmask 261120  }
   0x4   :  { %250 = vmatpush3.bf16.msra.mxu0 %v249_v3  ;;  %v117_v6 = vld [vmem:[%s371_s3] sm:$0xff]  ;;  %v119_v14 = vld [vmem:[%s371_s3 + $0x10] sm:$0xff]  ;;  %v120_v15 = vld [vmem:[%s371_s3 + $0x18] sm:$0xff]  ;;  %s296_s9 = smov [#allocation2]  }
   0x5   :  { %v252_v8 = vpack.c.bf16 %v118_v7, %v117_v6  ;;  %v217_v9 = vld [vmem:[%s370_s2] ss:$0 sm:$0xff]  ;;  %v255_v16 = vpack.c.bf16 %v120_v15, %v119_v14  ;;  %s295_s2 = smov 96   ;;  %s209_s3 = sshll.u32 %s296_s9, 4  ;;  %s210_s3 = int_to_ptr.vmem [resolvable:$true] %s209_s3 }
   0x6   :  { %v220_v23 = vld [vmem:[%s372_s4] ss:$0 sm:$0xff]  ;;  %s268_s10 = scalar_lea.vmem %s210_s3, 128  ;;  %p273_p1 = scmp.lt.s32.totalorder %s210_s3, %s210_s3 }
   0x7   :  { %235 = vmatmul.mubr.msk.f32.vlgmr.msra.gmra.mrb[0].mxu0 %vm31_vm1, %v21_v5  ;;  %253 = vmatpush3.bf16.msra.mxu1 %v252_v8  ;;  %p269_p0 = scmp.ne.s32.totalorder %s210_s3, %s268_s10  ;;  %p274_p2 = scmp.lt.s32.totalorder %s268_s10, %s268_s10 }
   0x8   :  { %254 = vmatprep.subr.bf16.mxu1 %v292_v2 }
   0x9   :  { %p275_p3 = por %p274_p2, %p273_p1 }
   0xb   :  { %256 = vmatpush3.bf16.msra.mxu1 %v255_v16  ;;  %p276_p4 = pnand %p275_p3, %p269_p0 }
  0xda   :  { %v101_v10 = vpop.f32.mrb[0].mxu0 }
  0xdb   :  { %v102_v11 = vadd.f32 %v217_v9, %v101_v10  ;;  %v236_v12 = vpop.f32.mrb[1].mxu0 }
  0xdd   :  { %v219_v13 = vmul.f32 -1.442695, %v102_v11 }
  0xdf   :  { %262 = vpow2.f32 %v219_v13 }
  0xe9   :  { %v263_v17 = vpop.eup %262 }
  0xea   :  { %v109_v18 = vadd.f32 1.0, %v263_v17 }
  0xec   :  { %264 = vrcp.f32 %v109_v18 }
  0xed   :  { %266 = vtanh.f32 %v102_v11 }
  0xf6   :  { %v265_v19 = vpop.eup %264 }
  0xf7   :  { %113 = vrot.lane.b32.xlu0 %v265_v19, %s295_s2  ;;  %v267_v20 = vpop.eup %266 }
 0x169   :  { %v114_v21 = vpop.permute.xlu0 %113 }
 0x16a   :  { %v116_v22 = vmul.f32 %v267_v20, %v114_v21 }
 0x16c   :  { %246 = vmatmul.mubr.msk.f32.vlgmr.msra.gmra.mrb[0].mxu1 %vm128_vm2, %v116_v22 }
 0x23f   :  { %v198_v24 = vpop.f32.mrb[0].mxu1 }
 0x240   :  { %v199_v25 = vadd.f32 %v220_v23, %v198_v24  ;;  %v247_v26 = vpop.f32.mrb[1].mxu1 }
 0x242   :  { %202 = vst.msk [vmem:[#allocation2] sm:$0xff] %vm31_vm1, %v199_v25 }
 0x243   :  { %279 = shalt.err (!%p276_p4)
}
 0x244   :  { %s280_s13 = scalar_lea.hbm %s373_s5, 128 }
 0x245   :  { %p281_p5 = scmp.ne.s32.totalorder %s373_s5, %s280_s13  ;;  %p284_p6 = scmp.lt.u32.totalorder %s280_s13, %s373_s5 }
 0x247   :  { %p286_p7 = pnand %p284_p6, %p281_p5 }
 0x249   :  { %289 = shalt.err (!%p286_p7)
}
 0x24a   :  { %212 = dma.vmem_to_hbm [thread:$0]  %s210_s3, 128, %s373_s5, [#allocation3]  }
 0x24b   :  { %290 = dma.done.wait [#allocation3], 128  }
 0x24c   :  { %291 = vsyncadd [#allocation3], 4294967168 }
 0x24d   :  { %216 = vsyncpa [#allocation3], 1 }

</bundles_post_ra>
